<compile_context>
chip_gen: v6e
topology: v6e:2x2x1
jax: 0.10.0
libtpu: 0.0.40
codegen_flags: <defaults>
</compile_context>

<pallas_src>
import functools

import jax
import jax.numpy as jnp
from jax.experimental import pallas as pl
from jax.experimental.pallas import tpu as pltpu


def _round_up(x, m):
    return (x + m - 1) // m * m


def _tensorcores_per_device():
    """Best-effort: 2 TensorCores per device on v7x-class chips, else 1."""
    try:
        kind = jax.devices()[0].device_kind.lower()
    except Exception:
        return 1
    return 2 if "v7" in kind else 1


def actor_mem_kernel(size_mem, action_size, seq_len, tt_steps, needs_mask,
                     state_ref, h0_ref,
                     w1_ref, b1_ref, w2_ref, b2_ref, w3_ref, b3_ref,
                     wih_ref, bih_ref, whh_ref, bhhn_ref,
                     whead_ref, bhead_ref,
                     heads_ref, h_ref):
    """TT GRU-actor steps for one batch tile; grid = (batch_tiles, T_blocks).

    h_ref (output block, resident across the T_blocks axis) is the recurrent
    carry; it is seeded from the (aliased) h0 input at t-block 0.
    """
    H = size_mem
    tb = pl.program_id(1)
    tile_b = h_ref.shape[0]

    @pl.when(tb == 0)
    def _():
        h_ref[...] = h0_ref[...]

    def mm(a_bf16, w_ref):
        # bf16 MXU inputs, f32 accumulation.
        return jnp.dot(a_bf16, w_ref[...], preferred_element_type=jnp.float32)

    def relu_bf16(y_f32):
        return jnp.maximum(y_f32, 0.0).astype(jnp.bfloat16)

    # ---- [R2] non-recurrent path, hoisted over all TT steps (M = TT*tile_b) ----
    x = state_ref[...].reshape(tt_steps * tile_b, state_ref.shape[-1])  # bf16
    x = relu_bf16(mm(x, w1_ref) + b1_ref[...])
    x = relu_bf16(mm(x, w2_ref) + b2_ref[...])
    x = relu_bf16(mm(x, w3_ref) + b3_ref[...])
    gi_all = mm(x, wih_ref) + bih_ref[...]          # (TT*tile_b, 3H) f32

    h = h_ref[...]                                  # (tile_b, H) f32 carry
    h_bf = h.astype(jnp.bfloat16)                   # [R7] bf16 shadow for W_hh
    bhhn = bhhn_ref[...]
    bhead = bhead_ref[...]

    # ---- [R1] unrolled recurrent loop over the TT timesteps of this block ------
    for tt in range(tt_steps):
        gi = gi_all[tt * tile_b:(tt + 1) * tile_b, :]       # static (aligned) slice
        gh = mm(h_bf, whh_ref)                              # (tile_b, 3H) f32

        # GRUCell, PyTorch gate order (r, z, n); b_hh_{r,z} pre-folded into b_ih.
        r = jax.nn.sigmoid(gi[:, 0:H] + gh[:, 0:H])
        z = jax.nn.sigmoid(gi[:, H:2 * H] + gh[:, H:2 * H])
        n = jnp.tanh(gi[:, 2 * H:3 * H] + r * (gh[:, 2 * H:3 * H] + bhhn))
        h_new = n + z * (h - n)                             # [R8] == (1-z)*n + z*h

        if needs_mask:
            # Freeze the carry on T-padding steps (heads there are sliced off).
            keep = ((tb * tt_steps + tt) < seq_len).astype(jnp.float32)
            h_new = h + keep * (h_new - h)

        h = h_new
        h_bf = h.astype(jnp.bfloat16)
        hr = jnp.maximum(h_bf, 0)                           # relu(h') for the heads
        # Fused mu/log_std head: single (H, 2A) matmul.   [R3 declined: see header]
        heads_ref[tt] = mm(hr, whead_ref) + bhead

    h_ref[...] = h


def actor_simple_mem_rollout(states, hidden, kp, *, state_size, action_size,
                             size_mem, tt_max=8):
    """Fused T-step rollout.  states: (T, ..., state_size); hidden: (B, size_mem)."""
    states = jnp.asarray(states)
    T = states.shape[0]
    states = states.reshape(T, -1, state_size).astype(jnp.bfloat16)   # [R7]
    hidden = jnp.asarray(hidden).astype(jnp.float32)
    B = states.shape[1]
    A = action_size
    H = size_mem

    # ---- batch tiling [R4]: pad to sublane-friendly size; split across TCs ------
    n_cores = _tensorcores_per_device()
    tile_b = min(256, _round_up(B, 16))
    if n_cores > 1 and B >= 256:
        tile_b = min(tile_b, max(128, _round_up(pl.cdiv(B, n_cores), 16)))
    Bp = _round_up(B, tile_b)
    n_btiles = Bp // tile_b

    # ---- T blocking [R1] ---------------------------------------------------------
    n_tblocks = pl.cdiv(T, tt_max)
    TT = pl.cdiv(T, n_tblocks)
    Tp = TT * n_tblocks
    needs_mask = (Tp != T)

    if Bp != B or Tp != T:
        states = jnp.pad(states, ((0, Tp - T), (0, Bp - B), (0, 0)))
    if Bp != B:
        hidden = jnp.pad(hidden, ((0, Bp - B), (0, 0)))

    flat = (kp["w1"], kp["b1"], kp["w2"], kp["b2"], kp["w3"], kp["b3"],
            kp["w_ih"], kp["b_ih"], kp["w_hh"], kp["b_hh_n"],
            kp["w_head"], kp["b_head"])

    def const_spec(arr):
        zeros = (0,) * arr.ndim
        # Constant block index -> weights DMA'd into VMEM once, stay resident.
        # [R5 declined]: default double-buffering kept (< 1 MB total).
        return pl.BlockSpec(arr.shape, lambda bi, tb, _z=zeros: _z)

    in_specs = [
        pl.BlockSpec((TT, tile_b, state_size), lambda bi, tb: (tb, bi, 0)),  # states
        pl.BlockSpec((tile_b, H), lambda bi, tb: (bi, 0)),                   # hidden in
    ] + [const_spec(a) for a in flat]

    out_specs = (
        pl.BlockSpec((TT, tile_b, 2 * A), lambda bi, tb: (tb, bi, 0)),  # [mu|log_std]
        pl.BlockSpec((tile_b, H), lambda bi, tb: (bi, 0)),              # new hidden
    )

    s1 = kp["w1"].shape[1]
    s2 = kp["w2"].shape[1]
    s3 = kp["w3"].shape[1]
    mm_flops_per_row = 2 * (state_size * s1 + s1 * s2 + s2 * s3
                            + s3 * 3 * H + H * 3 * H + H * 2 * A)
    param_bytes = sum(int(a.size) * a.dtype.itemsize for a in flat)
    cost = pl.CostEstimate(                                   # [R8] honest hint
        flops=Tp * Bp * mm_flops_per_row,
        transcendentals=Tp * Bp * 3 * H,
        bytes_accessed=n_btiles * param_bytes
        + Tp * Bp * (state_size * 2 + 2 * A * 4) + 2 * Bp * H * 4,
    )

    fn = pl.pallas_call(
        functools.partial(actor_mem_kernel, H, A, T, TT, needs_mask),
        grid=(n_btiles, n_tblocks),
        in_specs=in_specs,
        out_specs=out_specs,
        out_shape=(
            jax.ShapeDtypeStruct((Tp, Bp, 2 * A), jnp.float32),  # fused heads
            jax.ShapeDtypeStruct((Bp, H), jnp.float32),          # final hidden
        ),
        input_output_aliases={1: 1},  # hidden in -> hidden out (in-place update)
        compiler_params=pltpu.CompilerParams(
            dimension_semantics=("parallel", "arbitrary"),
            vmem_limit_bytes=32 * 1024 * 1024),                  # [R6]
        cost_estimate=cost,
    )

    heads, h_new = fn(states, hidden, *flat)
    mu = heads[:T, :B, :A]
    log_std = heads[:T, :B, A:]
    return mu, log_std, h_new[:B]


def actor_simple_mem_forward(state, hidden, kp, *, state_size, action_size,
                             size_mem):
    """Exact equivalent of ActorSimpleMem.forward((state, hidden)) — one GRU step."""
    x = jnp.asarray(state).reshape(-1, state_size)
    mu, log_std, h_new = actor_simple_mem_rollout(
        x[None], hidden, kp, state_size=state_size,
        action_size=action_size, size_mem=size_mem)
    return mu[0], log_std[0], h_new


def init_params(key, state_size, action_size, size_1, size_2, size_3, size_mem):
    """Deterministic synthetic parameters (PyTorch-style uniform(-1/sqrt(fan_in)))."""
    def linear(key, fan_in, fan_out):
        kw, kb = jax.random.split(key)
        bound = 1.0 / jnp.sqrt(fan_in)
        # stored transposed: (in, out)
        w = jax.random.uniform(kw, (fan_in, fan_out), jnp.float32, -bound, bound)
        b = jax.random.uniform(kb, (1, fan_out), jnp.float32, -bound, bound)
        return w, b

    keys = jax.random.split(key, 8)
    w1, b1 = linear(keys[0], state_size, size_1)
    w2, b2 = linear(keys[1], size_1, size_2)
    w3, b3 = linear(keys[2], size_2, size_3)
    w_ih, b_ih = linear(keys[3], size_3, 3 * size_mem)     # GRU input weights^T
    w_hh, b_hh = linear(keys[4], size_mem, 3 * size_mem)   # GRU hidden weights^T
    w_mu, b_mu = linear(keys[5], size_mem, action_size)
    w_ls, b_ls = linear(keys[6], size_mem, action_size)
    return dict(w1=w1, b1=b1, w2=w2, b2=b2, w3=w3, b3=b3,
                w_ih=w_ih, b_ih=b_ih, w_hh=w_hh, b_hh=b_hh,
                w_mu=w_mu, b_mu=b_mu, w_ls=w_ls, b_ls=b_ls)


def prepare_params(p, size_mem):
    """Kernel-ready params: bf16 weights, folded GRU biases, fused mu/log_std head."""
    H = size_mem
    b_ih = p["b_ih"]
    b_hh = p["b_hh"]
    b_ih_folded = jnp.concatenate(
        [b_ih[:, :2 * H] + b_hh[:, :2 * H], b_ih[:, 2 * H:]], axis=1)
    b_hh_n = b_hh[:, 2 * H:]
    w_head = jnp.concatenate([p["w_mu"], p["w_ls"]], axis=1)
    b_head = jnp.concatenate([p["b_mu"], p["b_ls"]], axis=1)

    def bf(w):
        return w.astype(jnp.bfloat16)

    return dict(
        w1=bf(p["w1"]), b1=p["b1"],
        w2=bf(p["w2"]), b2=p["b2"],
        w3=bf(p["w3"]), b3=p["b3"],
        w_ih=bf(p["w_ih"]), b_ih=b_ih_folded,
        w_hh=bf(p["w_hh"]), b_hh_n=b_hh_n,
        w_head=bf(w_head), b_head=b_head,
    )


def reference_rollout(states, hidden, kp, *, state_size, action_size, size_mem):
    """Pure-JAX reference with matching numerics (bf16 weights, f32 accum/gates)."""
    H = size_mem
    A = action_size

    def mm(a, w):
        return jnp.dot(a.astype(jnp.bfloat16), w.astype(jnp.bfloat16),
                       preferred_element_type=jnp.float32)

    mus, lss = [], []
    h = jnp.asarray(hidden).astype(jnp.float32)
    for t in range(states.shape[0]):
        x = states[t].reshape(-1, state_size).astype(jnp.float32)
        x = jax.nn.relu(mm(x, kp["w1"]) + kp["b1"])
        x = jax.nn.relu(mm(x, kp["w2"]) + kp["b2"])
        x = jax.nn.relu(mm(x, kp["w3"]) + kp["b3"])
        gi = mm(x, kp["w_ih"]) + kp["b_ih"]
        gh = mm(h, kp["w_hh"])
        r = jax.nn.sigmoid(gi[:, :H] + gh[:, :H])
        z = jax.nn.sigmoid(gi[:, H:2 * H] + gh[:, H:2 * H])
        n = jnp.tanh(gi[:, 2 * H:] + r * (gh[:, 2 * H:] + kp["b_hh_n"]))
        h = n + z * (h - n)
        head = mm(jax.nn.relu(h), kp["w_head"]) + kp["b_head"]
        mus.append(head[:, :A])
        lss.append(head[:, A:])
    return jnp.stack(mus), jnp.stack(lss), h


if __name__ == "__main__":
    # Small shapes consistent with the module defaults.
    state_size, action_size = 16, 4
    size_1, size_2, size_3, size_mem = 32, 64, 32, 256
    batch, T = 2, 11   # T=11 exercises T-blocking with a masked (padded) last block

    key = jax.random.PRNGKey(0)
    k_params, k_state, k_hidden, k_states = jax.random.split(key, 4)

    raw = init_params(k_params, state_size, action_size,
                      size_1, size_2, size_3, size_mem)
    kp = prepare_params(raw, size_mem)

    state = jax.random.normal(k_state, (batch, state_size), jnp.float32)
    hidden = jax.random.normal(k_hidden, (batch, size_mem), jnp.float32)

    # --- single step: exact semantics of ActorSimpleMem.forward -----------------
    mu, log_std, h_new = actor_simple_mem_forward(
        state, hidden, kp, state_size=state_size,
        action_size=action_size, size_mem=size_mem)
    jax.block_until_ready((mu, log_std, h_new))

    mu_r, ls_r, h_r = reference_rollout(
        state[None], hidden, kp, state_size=state_size,
        action_size=action_size, size_mem=size_mem)
    assert jnp.allclose(mu, mu_r[0], atol=2e-3, rtol=2e-3)
    assert jnp.allclose(log_std, ls_r[0], atol=2e-3, rtol=2e-3)
    assert jnp.allclose(h_new, h_r, atol=2e-3, rtol=2e-3)

    # --- fused T-step rollout (weights resident, T blocked, hidden carried) -----
    states = jax.random.normal(k_states, (T, batch, state_size), jnp.float32)
    mu_t, ls_t, h_t = actor_simple_mem_rollout(
        states, hidden, kp, state_size=state_size,
        action_size=action_size, size_mem=size_mem, tt_max=8)
    jax.block_until_ready((mu_t, ls_t, h_t))

    mu_tr, ls_tr, h_tr = reference_rollout(
        states, hidden, kp, state_size=state_size,
        action_size=action_size, size_mem=size_mem)
    assert jnp.allclose(mu_t, mu_tr, atol=5e-3, rtol=5e-3)
    assert jnp.allclose(ls_t, ls_tr, atol=5e-3, rtol=5e-3)
    assert jnp.allclose(h_t, h_tr, atol=5e-3, rtol=5e-3)

    print("KERNEL_OK")
</pallas_src>

<mosaic_0001>
module attributes {stable_mosaic.version = 11 : i64} {
  func.func @actor_mem_kernel(%arg0: i32, %arg1: i32, %arg2: memref<1x16x16xbf16, #tpu.memory_space<vmem>>, %arg3: memref<16x256xf32, #tpu.memory_space<vmem>>, %arg4: memref<16x32xbf16, #tpu.memory_space<vmem>>, %arg5: memref<1x32xf32, #tpu.memory_space<vmem>>, %arg6: memref<32x64xbf16, #tpu.memory_space<vmem>>, %arg7: memref<1x64xf32, #tpu.memory_space<vmem>>, %arg8: memref<64x32xbf16, #tpu.memory_space<vmem>>, %arg9: memref<1x32xf32, #tpu.memory_space<vmem>>, %arg10: memref<32x768xbf16, #tpu.memory_space<vmem>>, %arg11: memref<1x768xf32, #tpu.memory_space<vmem>>, %arg12: memref<256x768xbf16, #tpu.memory_space<vmem>>, %arg13: memref<1x256xf32, #tpu.memory_space<vmem>>, %arg14: memref<256x8xbf16, #tpu.memory_space<vmem>>, %arg15: memref<1x8xf32, #tpu.memory_space<vmem>>, %arg16: memref<1x16x8xf32, #tpu.memory_space<vmem>>, %arg17: memref<16x256xf32, #tpu.memory_space<vmem>>) attributes {dimension_semantics = [#tpu.dimension_semantics<parallel>, #tpu.dimension_semantics<arbitrary>], iteration_bounds = array<i64: 1, 1>, scalar_prefetch = 0 : i64, scratch_operands = 0 : i64, tpu.core_type = #tpu.core_type<tc>, window_params = [{transform_indices = @transform_0, window_bounds = array<i64: 1, 16, 16>}, {transform_indices = @transform_1, window_bounds = array<i64: 16, 256>}, {pipeline_mode = #tpu.pipeline_mode<synchronous>, transform_indices = @transform_2, window_bounds = array<i64: 16, 32>}, {pipeline_mode = #tpu.pipeline_mode<synchronous>, transform_indices = @transform_3, window_bounds = array<i64: 1, 32>}, {pipeline_mode = #tpu.pipeline_mode<synchronous>, transform_indices = @transform_4, window_bounds = array<i64: 32, 64>}, {pipeline_mode = #tpu.pipeline_mode<synchronous>, transform_indices = @transform_5, window_bounds = array<i64: 1, 64>}, {pipeline_mode = #tpu.pipeline_mode<synchronous>, transform_indices = @transform_6, window_bounds = array<i64: 64, 32>}, {pipeline_mode = #tpu.pipeline_mode<synchronous>, transform_indices = @transform_7, window_bounds = array<i64: 1, 32>}, {pipeline_mode = #tpu.pipeline_mode<synchronous>, transform_indices = @transform_8, window_bounds = array<i64: 32, 768>}, {pipeline_mode = #tpu.pipeline_mode<synchronous>, transform_indices = @transform_9, window_bounds = array<i64: 1, 768>}, {pipeline_mode = #tpu.pipeline_mode<synchronous>, transform_indices = @transform_10, window_bounds = array<i64: 256, 768>}, {pipeline_mode = #tpu.pipeline_mode<synchronous>, transform_indices = @transform_11, window_bounds = array<i64: 1, 256>}, {pipeline_mode = #tpu.pipeline_mode<synchronous>, transform_indices = @transform_12, window_bounds = array<i64: 256, 8>}, {pipeline_mode = #tpu.pipeline_mode<synchronous>, transform_indices = @transform_13, window_bounds = array<i64: 1, 8>}, {transform_indices = @transform_14, window_bounds = array<i64: 1, 16, 8>}, {transform_indices = @transform_15, window_bounds = array<i64: 16, 256>}]} {
    %c0_i32 = arith.constant 0 : i32
    %0 = arith.cmpi eq, %arg1, %c0_i32 : i32
    %1 = arith.extui %0 : i1 to i32
    %c0_i32_0 = arith.constant 0 : i32
    %2 = arith.cmpi ne, %1, %c0_i32_0 : i32
    scf.if %2 {
      %c0_45 = arith.constant 0 : index
      %c0_46 = arith.constant 0 : index
      %77 = vector.load %arg3[%c0_45, %c0_46] : memref<16x256xf32, #tpu.memory_space<vmem>>, vector<16x256xf32>
      %c0_47 = arith.constant 0 : index
      %c0_48 = arith.constant 0 : index
      %78 = vector.load %arg17[%c0_47, %c0_48] : memref<16x256xf32, #tpu.memory_space<vmem>>, vector<16x256xf32>
      tpu.vector_store %arg17[%c0_47, %c0_48], %77 {strides = array<i32>} : memref<16x256xf32, #tpu.memory_space<vmem>>, vector<16x256xf32>,
    } else {
    }
    %c0 = arith.constant 0 : index
    %c0_1 = arith.constant 0 : index
    %c0_2 = arith.constant 0 : index
    %3 = vector.load %arg2[%c0, %c0_1, %c0_2] : memref<1x16x16xbf16, #tpu.memory_space<vmem>>, vector<1x16x16xbf16>
    %4 = vector.shape_cast %3 : vector<1x16x16xbf16> to vector<16x16xbf16>
    %c0_3 = arith.constant 0 : index
    %c0_4 = arith.constant 0 : index
    %5 = vector.load %arg4[%c0_3, %c0_4] : memref<16x32xbf16, #tpu.memory_space<vmem>>, vector<16x32xbf16>
    %cst = arith.constant dense<0.000000e+00> : vector<16x32xf32>
    %6 = tpu.matmul %4, %5, %cst {dimension_numbers = #tpu.dot_dimension_numbers<[1], [0], [0], [1], [0, 0, 1, 1], [], []>} : vector<16x16xbf16>, vector<16x32xbf16>, vector<16x32xf32> -> vector<16x32xf32>
    %c0_5 = arith.constant 0 : index
    %c0_6 = arith.constant 0 : index
    %7 = vector.load %arg5[%c0_5, %c0_6] : memref<1x32xf32, #tpu.memory_space<vmem>>, vector<1x32xf32>
    %8 = vector.broadcast %7 : vector<1x32xf32> to vector<16x32xf32>
    %9 = arith.addf %6, %8 : vector<16x32xf32>
    %cst_7 = arith.constant 0.000000e+00 : f32
    %10 = vector.broadcast %cst_7 : f32 to vector<16x32xf32>
    %11 = arith.maximumf %9, %10 : vector<16x32xf32>
    %12 = arith.truncf %11 : vector<16x32xf32> to vector<16x32xbf16>
    %c0_8 = arith.constant 0 : index
    %c0_9 = arith.constant 0 : index
    %13 = vector.load %arg6[%c0_8, %c0_9] : memref<32x64xbf16, #tpu.memory_space<vmem>>, vector<32x64xbf16>
    %cst_10 = arith.constant dense<0.000000e+00> : vector<16x64xf32>
    %14 = tpu.matmul %12, %13, %cst_10 {dimension_numbers = #tpu.dot_dimension_numbers<[1], [0], [0], [1], [0, 0, 1, 1], [], []>} : vector<16x32xbf16>, vector<32x64xbf16>, vector<16x64xf32> -> vector<16x64xf32>
    %c0_11 = arith.constant 0 : index
    %c0_12 = arith.constant 0 : index
    %15 = vector.load %arg7[%c0_11, %c0_12] : memref<1x64xf32, #tpu.memory_space<vmem>>, vector<1x64xf32>
    %16 = vector.broadcast %15 : vector<1x64xf32> to vector<16x64xf32>
    %17 = arith.addf %14, %16 : vector<16x64xf32>
    %cst_13 = arith.constant 0.000000e+00 : f32
    %18 = vector.broadcast %cst_13 : f32 to vector<16x64xf32>
    %19 = arith.maximumf %17, %18 : vector<16x64xf32>
    %20 = arith.truncf %19 : vector<16x64xf32> to vector<16x64xbf16>
    %c0_14 = arith.constant 0 : index
    %c0_15 = arith.constant 0 : index
    %21 = vector.load %arg8[%c0_14, %c0_15] : memref<64x32xbf16, #tpu.memory_space<vmem>>, vector<64x32xbf16>
    %cst_16 = arith.constant dense<0.000000e+00> : vector<16x32xf32>
    %22 = tpu.matmul %20, %21, %cst_16 {dimension_numbers = #tpu.dot_dimension_numbers<[1], [0], [0], [1], [0, 0, 1, 1], [], []>} : vector<16x64xbf16>, vector<64x32xbf16>, vector<16x32xf32> -> vector<16x32xf32>
    %c0_17 = arith.constant 0 : index
    %c0_18 = arith.constant 0 : index
    %23 = vector.load %arg9[%c0_17, %c0_18] : memref<1x32xf32, #tpu.memory_space<vmem>>, vector<1x32xf32>
    %24 = vector.broadcast %23 : vector<1x32xf32> to vector<16x32xf32>
    %25 = arith.addf %22, %24 : vector<16x32xf32>
    %cst_19 = arith.constant 0.000000e+00 : f32
    %26 = vector.broadcast %cst_19 : f32 to vector<16x32xf32>
    %27 = arith.maximumf %25, %26 : vector<16x32xf32>
    %28 = arith.truncf %27 : vector<16x32xf32> to vector<16x32xbf16>
    %c0_20 = arith.constant 0 : index
    %c0_21 = arith.constant 0 : index
    %29 = vector.load %arg10[%c0_20, %c0_21] : memref<32x768xbf16, #tpu.memory_space<vmem>>, vector<32x768xbf16>
    %cst_22 = arith.constant dense<0.000000e+00> : vector<16x768xf32>
    %30 = tpu.matmul %28, %29, %cst_22 {dimension_numbers = #tpu.dot_dimension_numbers<[1], [0], [0], [1], [0, 0, 1, 1], [], []>} : vector<16x32xbf16>, vector<32x768xbf16>, vector<16x768xf32> -> vector<16x768xf32>
    %c0_23 = arith.constant 0 : index
    %c0_24 = arith.constant 0 : index
    %31 = vector.load %arg11[%c0_23, %c0_24] : memref<1x768xf32, #tpu.memory_space<vmem>>, vector<1x768xf32>
    %32 = vector.broadcast %31 : vector<1x768xf32> to vector<16x768xf32>
    %33 = arith.addf %30, %32 : vector<16x768xf32>
    %c0_25 = arith.constant 0 : index
    %c0_26 = arith.constant 0 : index
    %34 = vector.load %arg17[%c0_25, %c0_26] : memref<16x256xf32, #tpu.memory_space<vmem>>, vector<16x256xf32>
    %35 = arith.truncf %34 : vector<16x256xf32> to vector<16x256xbf16>
    %c0_27 = arith.constant 0 : index
    %c0_28 = arith.constant 0 : index
    %36 = vector.load %arg13[%c0_27, %c0_28] : memref<1x256xf32, #tpu.memory_space<vmem>>, vector<1x256xf32>
    %c0_29 = arith.constant 0 : index
    %c0_30 = arith.constant 0 : index
    %37 = vector.load %arg15[%c0_29, %c0_30] : memref<1x8xf32, #tpu.memory_space<vmem>>, vector<1x8xf32>
    %c0_31 = arith.constant 0 : index
    %c0_32 = arith.constant 0 : index
    %38 = vector.load %arg12[%c0_31, %c0_32] : memref<256x768xbf16, #tpu.memory_space<vmem>>, vector<256x768xbf16>
    %cst_33 = arith.constant dense<0.000000e+00> : vector<16x768xf32>
    %39 = tpu.matmul %35, %38, %cst_33 {dimension_numbers = #tpu.dot_dimension_numbers<[1], [0], [0], [1], [0, 0, 1, 1], [], []>} : vector<16x256xbf16>, vector<256x768xbf16>, vector<16x768xf32> -> vector<16x768xf32>
    %40 = vector.extract_strided_slice %33 {offsets = [0, 0], sizes = [16, 256], strides = [1, 1]} : vector<16x768xf32> to vector<16x256xf32>
    %41 = vector.extract_strided_slice %39 {offsets = [0, 0], sizes = [16, 256], strides = [1, 1]} : vector<16x768xf32> to vector<16x256xf32>
    %42 = arith.addf %40, %41 : vector<16x256xf32>
    %43 = arith.negf %42 : vector<16x256xf32>
    %44 = math.exp %43 : vector<16x256xf32>
    %cst_34 = arith.constant 1.000000e+00 : f32
    %45 = vector.broadcast %cst_34 : f32 to vector<16x256xf32>
    %46 = arith.addf %45, %44 : vector<16x256xf32>
    %47 = arith.divf %45, %46 : vector<16x256xf32>
    %48 = vector.extract_strided_slice %33 {offsets = [0, 256], sizes = [16, 256], strides = [1, 1]} : vector<16x768xf32> to vector<16x256xf32>
    %49 = vector.extract_strided_slice %39 {offsets = [0, 256], sizes = [16, 256], strides = [1, 1]} : vector<16x768xf32> to vector<16x256xf32>
    %50 = arith.addf %48, %49 : vector<16x256xf32>
    %51 = arith.negf %50 : vector<16x256xf32>
    %52 = math.exp %51 : vector<16x256xf32>
    %cst_35 = arith.constant 1.000000e+00 : f32
    %53 = vector.broadcast %cst_35 : f32 to vector<16x256xf32>
    %54 = arith.addf %53, %52 : vector<16x256xf32>
    %55 = arith.divf %53, %54 : vector<16x256xf32>
    %56 = vector.extract_strided_slice %33 {offsets = [0, 512], sizes = [16, 256], strides = [1, 1]} : vector<16x768xf32> to vector<16x256xf32>
    %57 = vector.extract_strided_slice %39 {offsets = [0, 512], sizes = [16, 256], strides = [1, 1]} : vector<16x768xf32> to vector<16x256xf32>
    %58 = vector.broadcast %36 : vector<1x256xf32> to vector<16x256xf32>
    %59 = arith.addf %57, %58 : vector<16x256xf32>
    %60 = arith.mulf %47, %59 : vector<16x256xf32>
    %61 = arith.addf %56, %60 : vector<16x256xf32>
    %62 = math.tanh %61 : vector<16x256xf32>
    %63 = arith.subf %34, %62 : vector<16x256xf32>
    %64 = arith.mulf %55, %63 : vector<16x256xf32>
    %65 = arith.addf %62, %64 : vector<16x256xf32>
    %66 = arith.truncf %65 : vector<16x256xf32> to vector<16x256xbf16>
    %cst_36 = arith.constant 0.000000e+00 : bf16
    %67 = vector.broadcast %cst_36 : bf16 to vector<16x256xbf16>
    %68 = arith.maximumf %66, %67 : vector<16x256xbf16>
    %c0_37 = arith.constant 0 : index
    %c0_38 = arith.constant 0 : index
    %69 = vector.load %arg14[%c0_37, %c0_38] : memref<256x8xbf16, #tpu.memory_space<vmem>>, vector<256x8xbf16>
    %cst_39 = arith.constant dense<0.000000e+00> : vector<16x8xf32>
    %70 = tpu.matmul %68, %69, %cst_39 {dimension_numbers = #tpu.dot_dimension_numbers<[1], [0], [0], [1], [0, 0, 1, 1], [], []>} : vector<16x256xbf16>, vector<256x8xbf16>, vector<16x8xf32> -> vector<16x8xf32>
    %71 = vector.broadcast %37 : vector<1x8xf32> to vector<16x8xf32>
    %72 = arith.addf %70, %71 : vector<16x8xf32>
    %c0_40 = arith.constant 0 : index
    %c0_41 = arith.constant 0 : index
    %c0_42 = arith.constant 0 : index
    %73 = vector.load %arg16[%c0_40, %c0_41, %c0_42] : memref<1x16x8xf32, #tpu.memory_space<vmem>>, vector<1x16x8xf32>
    %74 = vector.shape_cast %73 : vector<1x16x8xf32> to vector<16x8xf32>
    %75 = vector.shape_cast %72 : vector<16x8xf32> to vector<1x16x8xf32>
    tpu.vector_store %arg16[%c0_40, %c0_41, %c0_42], %75 {strides = array<i32>} : memref<1x16x8xf32, #tpu.memory_space<vmem>>, vector<1x16x8xf32>,
    %c0_43 = arith.constant 0 : index
    %c0_44 = arith.constant 0 : index
    %76 = vector.load %arg17[%c0_43, %c0_44] : memref<16x256xf32, #tpu.memory_space<vmem>>, vector<16x256xf32>
    tpu.vector_store %arg17[%c0_43, %c0_44], %65 {strides = array<i32>} : memref<16x256xf32, #tpu.memory_space<vmem>>, vector<16x256xf32>,
    return
  }
  func.func @transform_0(%arg0: i32, %arg1: i32) -> (i32, i32, i32) {
    %c0_i32 = arith.constant 0 : i32
    %c0_i32_0 = arith.constant 0 : i32
    return %arg1, %arg0, %c0_i32 : i32, i32, i32
  }
  func.func @transform_1(%arg0: i32, %arg1: i32) -> (i32, i32) {
    %c0_i32 = arith.constant 0 : i32
    %c0_i32_0 = arith.constant 0 : i32
    return %arg0, %c0_i32 : i32, i32
  }
  func.func @transform_2(%arg0: i32, %arg1: i32) -> (i32, i32) {
    %c0_i32 = arith.constant 0 : i32
    %c0_i32_0 = arith.constant 0 : i32
    %c0_i32_1 = arith.constant 0 : i32
    return %c0_i32, %c0_i32_0 : i32, i32
  }
  func.func @transform_3(%arg0: i32, %arg1: i32) -> (i32, i32) {
    %c0_i32 = arith.constant 0 : i32
    %c0_i32_0 = arith.constant 0 : i32
    %c0_i32_1 = arith.constant 0 : i32
    return %c0_i32, %c0_i32_0 : i32, i32
  }
  func.func @transform_4(%arg0: i32, %arg1: i32) -> (i32, i32) {
    %c0_i32 = arith.constant 0 : i32
    %c0_i32_0 = arith.constant 0 : i32
    %c0_i32_1 = arith.constant 0 : i32
    return %c0_i32, %c0_i32_0 : i32, i32
  }
  func.func @transform_5(%arg0: i32, %arg1: i32) -> (i32, i32) {
    %c0_i32 = arith.constant 0 : i32
    %c0_i32_0 = arith.constant 0 : i32
    %c0_i32_1 = arith.constant 0 : i32
    return %c0_i32, %c0_i32_0 : i32, i32
  }
  func.func @transform_6(%arg0: i32, %arg1: i32) -> (i32, i32) {
    %c0_i32 = arith.constant 0 : i32
    %c0_i32_0 = arith.constant 0 : i32
    %c0_i32_1 = arith.constant 0 : i32
    return %c0_i32, %c0_i32_0 : i32, i32
  }
  func.func @transform_7(%arg0: i32, %arg1: i32) -> (i32, i32) {
    %c0_i32 = arith.constant 0 : i32
    %c0_i32_0 = arith.constant 0 : i32
    %c0_i32_1 = arith.constant 0 : i32
    return %c0_i32, %c0_i32_0 : i32, i32
  }
  func.func @transform_8(%arg0: i32, %arg1: i32) -> (i32, i32) {
    %c0_i32 = arith.constant 0 : i32
    %c0_i32_0 = arith.constant 0 : i32
    %c0_i32_1 = arith.constant 0 : i32
    return %c0_i32, %c0_i32_0 : i32, i32
  }
  func.func @transform_9(%arg0: i32, %arg1: i32) -> (i32, i32) {
    %c0_i32 = arith.constant 0 : i32
    %c0_i32_0 = arith.constant 0 : i32
    %c0_i32_1 = arith.constant 0 : i32
    return %c0_i32, %c0_i32_0 : i32, i32
  }
  func.func @transform_10(%arg0: i32, %arg1: i32) -> (i32, i32) {
    %c0_i32 = arith.constant 0 : i32
    %c0_i32_0 = arith.constant 0 : i32
    %c0_i32_1 = arith.constant 0 : i32
    return %c0_i32, %c0_i32_0 : i32, i32
  }
  func.func @transform_11(%arg0: i32, %arg1: i32) -> (i32, i32) {
    %c0_i32 = arith.constant 0 : i32
    %c0_i32_0 = arith.constant 0 : i32
    %c0_i32_1 = arith.constant 0 : i32
    return %c0_i32, %c0_i32_0 : i32, i32
  }
  func.func @transform_12(%arg0: i32, %arg1: i32) -> (i32, i32) {
    %c0_i32 = arith.constant 0 : i32
    %c0_i32_0 = arith.constant 0 : i32
    %c0_i32_1 = arith.constant 0 : i32
    return %c0_i32, %c0_i32_0 : i32, i32
  }
  func.func @transform_13(%arg0: i32, %arg1: i32) -> (i32, i32) {
    %c0_i32 = arith.constant 0 : i32
    %c0_i32_0 = arith.constant 0 : i32
    %c0_i32_1 = arith.constant 0 : i32
    return %c0_i32, %c0_i32_0 : i32, i32
  }
  func.func @transform_14(%arg0: i32, %arg1: i32) -> (i32, i32, i32) {
    %c0_i32 = arith.constant 0 : i32
    %c0_i32_0 = arith.constant 0 : i32
    return %arg1, %arg0, %c0_i32 : i32, i32, i32
  }
  func.func @transform_15(%arg0: i32, %arg1: i32) -> (i32, i32) {
    %c0_i32 = arith.constant 0 : i32
    %c0_i32_0 = arith.constant 0 : i32
    return %arg0, %c0_i32 : i32, i32
  }
}

</mosaic_0001>

<bundles_post_ra>
// kernel: tpu_custom_call.1
= control target key start
LH: loop header
LB: loop body
LE: loop exit
PB: predicated region body
PF: predicated region fallthrough
CT: control target
= control target key end

     0   :  { %21 = vsyncpa [#allocation3], 0  ;;  %s2005_s18 = smov [#allocation2]   ;;  %s2324_s0 = inlined_call_operand.vmem [shape: bf16[1,16,16], index: 0, kind: input, shape index: {}]   ;;  %s2325_s1 = inlined_call_operand.vmem [shape: f32[16,256], index: 1, kind: input, shape index: {}, may-alias: {1,15}]   ;;  %s2326_s2 = inlined_call_operand.vmem [shape: bf16[16,32], index: 2, kind: input, shape index: {}]   ;;  %s2327_s3 = inlined_call_operand.vmem [shape: f32[1,32], index: 3, kind: input, shape index: {}]   ;;  %s2328_s4 = inlined_call_operand.vmem [shape: bf16[32,64], index: 4, kind: input, shape index: {}]   ;;  %s2329_s5 = inlined_call_operand.vmem [shape: f32[1,64], index: 5, kind: input, shape index: {}]   ;;  %s2330_s6 = inlined_call_operand.vmem [shape: bf16[64,32], index: 6, kind: input, shape index: {}]   ;;  %s2331_s7 = inlined_call_operand.vmem [shape: f32[1,32], index: 7, kind: input, shape index: {}]   ;;  %s2332_s8 = inlined_call_operand.vmem [shape: bf16[32,768], index: 8, kind: input, shape index: {}]   ;;  %s2333_s9 = inlined_call_operand.vmem [shape: f32[1,768], index: 9, kind: input, shape index: {}]   ;;  %s2334_s10 = inlined_call_operand.hbm [shape: bf16[256,768], index: 10, kind: input, shape index: {}]   ;;  %s2335_s11 = inlined_call_operand.vmem [shape: f32[1,256], index: 11, kind: input, shape index: {}]   ;;  %s2336_s12 = inlined_call_operand.vmem [shape: bf16[256,8], index: 12, kind: input, shape index: {}]   ;;  %s2337_s13 = inlined_call_operand.vmem [shape: f32[1,8], index: 13, kind: input, shape index: {}]   ;;  %s2338_s14 = inlined_call_operand.vmem [shape: f32[1,16,8], index: 14, kind: output, shape index: {0}]   ;;  %s2339_s15 = inlined_call_operand.vmem [shape: f32[16,256], index: 15, kind: output, shape index: {1}, may-alias: {1,15}]  }
   0x1   :  { %s47_s19 = sshll.u32 %s2005_s18, 4  ;;  %s48_s19 = int_to_ptr.vmem [resolvable:$true] %s47_s19 }
   0x2   :  { %s1991_s20 = scalar_lea.vmem %s48_s19, 12288  ;;  %p1996_p1 = scmp.lt.s32.totalorder %s48_s19, %s48_s19 }
   0x3   :  { %p1992_p0 = scmp.ne.s32.totalorder %s48_s19, %s1991_s20  ;;  %p1997_p2 = scmp.lt.s32.totalorder %s1991_s20, %s1991_s20 }
   0x5   :  { %p1998_p3 = por %p1997_p2, %p1996_p1 }
   0x7   :  { %p1999_p4 = pnand %p1998_p3, %p1992_p0 }
   0x9   :  { %2002 = shalt.err (!%p1999_p4)
}
   0xa   :  { %s2006_s21 = smov 384   ;;  %s2007_s22 = smov 24  }
   0xb   :  { %53 = dma.hbm_to_vmem [thread:$0]  %s2334_s10, 12288, %s48_s19, [#allocation3], %s2006_s21, %s2006_s21, %s2007_s22  }
   0xc   :  { %2003 = dma.done.wait [#allocation3], 12288  }
   0xd   :  { %2004 = vsyncadd [#allocation3], 4294955008  ;;  %v2008_v0 = vmov 0.0   ;;  %vm2009_vm0 = vmmov 0   ;;  %v1757_v1 = vld [vmem:[%s2326_s2] sm:$0xff]   ;;  %vm98_vm1 = vcmask 130048  }
   0xe   :  { %1725 = vmatprep.subr.bf16.mxu0 %v2008_v0  ;;  %1727 = vmatprep.mubr.msk.bf16.mxu0 %vm2009_vm0, %v2008_v0  ;;  %v1758_v2 = vld [vmem:[%s2324_s0] sm:$0xff]   ;;  %v1759_v3 = vld [vmem:[%s2328_s4 + $0x8] sm:$0xff]   ;;  %vm169_vm2 = vcmask 261120   ;;  %v1761_v14 = vld [vmem:[%s2330_s6 + $0x18] sm:$0xff]   ;;  %vm256_vm3 = vcmask 523264   ;;  %v2010_v39 = vmov 0  }
   0xf   :  { %1726 = vmatpush3.bf16.msra.mxu0 %v1757_v1  ;;  %v1760_v4 = vld [vmem:[%s2328_s4] sm:$0xff]   ;;  %v1762_v16 = vld [vmem:[%s2330_s6 + $0x10] sm:$0xff]   ;;  %v1763_v17 = vld [vmem:[%s2330_s6 + $0x8] sm:$0xff]   ;;  %486 = vmatprep.mubr.bf16.mxu1 %v2010_v39  ;;  %vm1527_vm4 = vcmask 64512  }
  0x10   :  { %1731 = vmatprep.subr.bf16.mxu0 %v2008_v0  ;;  %v1543_v5 = vld [vmem:[%s2327_s3] ss:$0 sm:$0xff]  ;;  %v1767_v29 = vld [vmem:[%s2332_s8 + $0x34] ss:$24 sps:$4 sm:$0xff]   ;;  %v1765_v31 = vld [vmem:[%s2332_s8 + $0x30] ss:$24 sps:$4 sm:$0xff]  }
  0x11   :  { %v1764_v18 = vld [vmem:[%s2330_s6] sm:$0xff]   ;;  %v1768_v30 = vld [vmem:[%s2332_s8 + $0x3c] ss:$24 sps:$4 sm:$0xff]   ;;  %v1770_v32 = vld [vmem:[%s2332_s8 + $0x38] ss:$24 sps:$4 sm:$0xff]  }
  0x12   :  { %1728 = vmatmul.mubr.msk.bf16.vlgmr.msra.gmra.mxu0 %vm98_vm1, %v1758_v2  ;;  %v1547_v19 = vld [vmem:[%s2329_s5] ss:$0 sm:$0xff]  ;;  %466 = vmatprep.subr.bf16.mxu1 %v1768_v30  ;;  %v1773_v33 = vld [vmem:[%s2332_s8 + $0x4] ss:$24 sps:$4 sm:$0xff]   ;;  %v1782_v38 = vld [vmem:[#allocation2 + $0x154] ss:$24 sps:$4 sm:$0xff]  }
  0x13   :  { %1735 = vmatprep.mubr.msk.bf16.mxu0 %vm2009_vm0, %v2008_v0  ;;  %1732 = vmatpush3.bf16.msra.mxu0 %v1759_v3  ;;  %v1774_v34 = vld [vmem:[%s2332_s8 + $0xc] ss:$24 sps:$4 sm:$0xff]   ;;  %v1771_v35 = vld [vmem:[%s2332_s8] ss:$24 sps:$4 sm:$0xff]   ;;  %v1780_v52 = vld [vmem:[#allocation2 + $0x150] ss:$24 sps:$4 sm:$0xff]  }
  0x14   :  { %1733 = vmatprep.subr.bf16.mxu0 %v2008_v0  ;;  %467 = vmatpush1.bf16.msra.mxu1 %v1770_v32  ;;  %v1776_v36 = vld [vmem:[%s2332_s8 + $0x8] ss:$24 sps:$4 sm:$0xff]   ;;  %v1779_v37 = vld [vmem:[%s2332_s8 + $0x44] ss:$24 sps:$4 sm:$0xff]   ;;  %v1785_v54 = vld [vmem:[%s2332_s8 + $0x14] ss:$24 sps:$4 sm:$0xff]  }
  0x15   :  { %468 = vmatprep.subr.bf16.mxu1 %v1774_v34  ;;  %v1551_v40 = vld [vmem:[%s2331_s7] ss:$0 sm:$0xff]  ;;  %v2163_v49 = vld [vmem:[%s2325_s1 + $0x8] sm:$0xff]  ;;  %v2168_v50 = vld [vmem:[%s2325_s1 + $0x18] sm:$0xff] }
  0x16   :  { %v1777_v51 = vld [vmem:[%s2332_s8 + $0x40] ss:$24 sps:$4 sm:$0xff]   ;;  %v1788_v55 = vld [vmem:[#allocation2 + $0x124] ss:$24 sps:$4 sm:$0xff]   ;;  %v2178_v56 = vpack.c.bf16 %v2168_v50, %v2163_v49  ;;  %v1783_v57 = vld [vmem:[%s2332_s8 + $0x10] ss:$24 sps:$4 sm:$0xff]  }
  0x17   :  { %1734 = vmatpush3.bf16.msra.mxu0 %v1760_v4  ;;  %v1786_v58 = vld [vmem:[#allocation2 + $0x120] ss:$24 sps:$4 sm:$0xff]   ;;  %v1791_v59 = vld [vmem:[#allocation2 + $0xf4] ss:$24 sps:$4 sm:$0xff]   ;;  %v1789_v61 = vld [vmem:[#allocation2 + $0xf0] ss:$24 sps:$4 sm:$0xff]  }
  0x18   :  { %1739 = vmatprep.subr.bf16.mxu0 %v2008_v0  ;;  %469 = vmatpush1.bf16.msra.mxu1 %v1776_v36  ;;  %v1794_v60 = vld [vmem:[#allocation2 + $0x15c] ss:$24 sps:$4 sm:$0xff]   ;;  %v1792_v62 = vld [vmem:[#allocation2 + $0x158] ss:$24 sps:$4 sm:$0xff]   ;;  %v1798_v2 = vld [vmem:[#allocation2 + $0x128] ss:$24 sps:$4 sm:$0xff]  }
  0x19   :  { %1124 = vmatprep.subr.bf16.mxu1 %v1782_v38  ;;  %v1797_v63 = vld [vmem:[#allocation2 + $0xc4] ss:$24 sps:$4 sm:$0xff]   ;;  %v1795_v1 = vld [vmem:[#allocation2 + $0xc0] ss:$24 sps:$4 sm:$0xff]   ;;  %v1803_v3 = vld [vmem:[#allocation2 + $0x94] ss:$24 sps:$4 sm:$0xff]  }
  0x1a   :  { %v1806_v4 = vld [vmem:[#allocation2 + $0xfc] ss:$24 sps:$4 sm:$0xff]   ;;  %v1840_v30 = vld [vmem:[#allocation2 + $0x2d8] ss:$24 sps:$4 sm:$0xff]   ;;  %v1848_v32 = vld [vmem:[#allocation2 + $0x2ac] ss:$24 sps:$4 sm:$0xff]  }
  0x1b   :  { %v1846_v34 = vld [vmem:[#allocation2 + $0x2a8] ss:$24 sps:$4 sm:$0xff]   ;;  %v1854_v36 = vld [vmem:[#allocation2 + $0x27c] ss:$24 sps:$4 sm:$0xff]   ;;  %v1852_v38 = vld [vmem:[#allocation2 + $0x278] ss:$24 sps:$4 sm:$0xff]  }
  0xd2   :  { %v136_v6 = vpop.f32.mrf.mxu0 }
  0xd3   :  { %v137_v8 = vadd.f32 %v1543_v5, %v136_v6  ;;  %v1804_v6 = vld [vmem:[#allocation2 + $0xf8] ss:$24 sps:$4 sm:$0xff]  }
  0xd4   :  { %v1729_v7 = vpop.f32.mrf.mxu0 }
  0xd5   :  { %v143_v12 = vmax.f32 %v137_v8, 0.0  ;;  %v1809_v7 = vld [vmem:[#allocation2 + $0x64] ss:$24 sps:$4 sm:$0xff]  }
  0xd6   :  { %v139_v9 = vpop.f32.mrf.mxu0  ;;  %v1812_v8 = vld [vmem:[#allocation2 + $0xcc] ss:$24 sps:$4 sm:$0xff]  }
  0xd7   :  { %v140_v10 = vadd.f32 %v1543_v5, %v139_v9  ;;  %v1801_v5 = vld [vmem:[#allocation2 + $0x90] ss:$24 sps:$4 sm:$0xff]   ;;  %v1807_v9 = vld [vmem:[#allocation2 + $0x60] ss:$24 sps:$4 sm:$0xff]  }
  0xd8   :  { %v1730_v11 = vpop.f32.mrf.mxu0 }
  0xd9   :  { %v144_v13 = vmax.f32 %v140_v10, 0.0  ;;  %v1810_v10 = vld [vmem:[#allocation2 + $0xc8] ss:$24 sps:$4 sm:$0xff]   ;;  %v1815_v11 = vld [vmem:[#allocation2 + $0x34] ss:$24 sps:$4 sm:$0xff]  }
  0xdb   :  { %v145_v15 = vpack.c.bf16 %v144_v13, %v143_v12  ;;  %v1818_v12 = vld [vmem:[#allocation2 + $0x9c] ss:$24 sps:$4 sm:$0xff]   ;;  %v1813_v13 = vld [vmem:[#allocation2 + $0x30] ss:$24 sps:$4 sm:$0xff]  }
  0xdd   :  { %1736 = vmatmul.mubr.msk.bf16.vlgmr.msra.gmra.mxu0 %vm169_vm2, %v145_v15  ;;  %v1821_v15 = vld [vmem:[#allocation2 + $0x4] ss:$24 sps:$4 sm:$0xff]  }
  0xde   :  { %1740 = vmatpush3.bf16.msra.mxu0 %v1761_v14  ;;  %1747 = vmatprep.mubr.msk.bf16.mxu0 %vm2009_vm0, %v2008_v0  ;;  %v1816_v14 = vld [vmem:[#allocation2 + $0x98] ss:$24 sps:$4 sm:$0xff]  }
  0xdf   :  { %1741 = vmatprep.subr.bf16.mxu0 %v2008_v0 }
  0xe2   :  { %1742 = vmatpush3.bf16.msra.mxu0 %v1762_v16  ;;  %v1824_v16 = vld [vmem:[#allocation2 + $0x6c] ss:$24 sps:$4 sm:$0xff]  }
  0xe3   :  { %1743 = vmatprep.subr.bf16.mxu0 %v2008_v0 }
  0xe6   :  { %1744 = vmatpush3.bf16.msra.mxu0 %v1763_v17  ;;  %v1819_v17 = vld [vmem:[#allocation2] ss:$24 sps:$4 sm:$0xff]  }
  0xe7   :  { %1745 = vmatprep.subr.bf16.mxu0 %v2008_v0  ;;  %v1800_v0 = vld [vmem:[#allocation2 + $0x12c] ss:$24 sps:$4 sm:$0xff]  }
  0xea   :  { %1746 = vmatpush3.bf16.msra.mxu0 %v1764_v18  ;;  %v1822_v18 = vld [vmem:[#allocation2 + $0x68] ss:$24 sps:$4 sm:$0xff]  }
  0xeb   :  { %423 = vmatprep.subr.bf16.mxu0 %v1767_v29  ;;  %v1837_v29 = vld [vmem:[#allocation2 + $0x270] ss:$24 sps:$4 sm:$0xff]  }
 0x19d   :  { %v207_v20 = vpop.f32.mrf.mxu0 }
 0x19e   :  { %v208_v22 = vadd.f32 %v1547_v19, %v207_v20  ;;  %v1830_v20 = vld [vmem:[#allocation2 + $0x3c] ss:$24 sps:$4 sm:$0xff]  }
 0x19f   :  { %v1737_v21 = vpop.f32.mrf.mxu0 }
 0x1a0   :  { %v214_v26 = vmax.f32 %v208_v22, 0.0  ;;  %v1825_v21 = vld [vmem:[#allocation2 + $0x2d0] ss:$24 sps:$4 sm:$0xff]  }
 0x1a1   :  { %v210_v23 = vpop.f32.mrf.mxu0  ;;  %v1828_v22 = vld [vmem:[#allocation2 + $0x38] ss:$24 sps:$4 sm:$0xff]  }
 0x1a2   :  { %v211_v24 = vadd.f32 %v1547_v19, %v210_v23  ;;  %v1827_v19 = vld [vmem:[#allocation2 + $0x2d4] ss:$24 sps:$4 sm:$0xff]   ;;  %v1833_v23 = vld [vmem:[#allocation2 + $0x2a4] ss:$24 sps:$4 sm:$0xff]  }
 0x1a3   :  { %v1738_v25 = vpop.f32.mrf.mxu0 }
 0x1a4   :  { %v215_v27 = vmax.f32 %v211_v24, 0.0  ;;  %v1836_v24 = vld [vmem:[#allocation2 + $0xc] ss:$24 sps:$4 sm:$0xff]   ;;  %v1831_v25 = vld [vmem:[#allocation2 + $0x2a0] ss:$24 sps:$4 sm:$0xff]  }
 0x1a6   :  { %v216_v28 = vpack.c.bf16 %v215_v27, %v214_v26  ;;  %v1834_v26 = vld [vmem:[#allocation2 + $0x8] ss:$24 sps:$4 sm:$0xff]   ;;  %v1839_v27 = vld [vmem:[#allocation2 + $0x274] ss:$24 sps:$4 sm:$0xff]  }
 0x1a8   :  { %1748 = vmatmul.mubr.msk.bf16.vlgmr.msra.gmra.mxu0 %vm256_vm3, %v216_v28  ;;  %v1842_v28 = vld [vmem:[#allocation2 + $0x2dc] ss:$24 sps:$4 sm:$0xff]  }
 0x1a9   :  { %424 = vmatpush1.bf16.msra.mxu0 %v1765_v31  ;;  %443 = vmatprep.mubr.bf16.mxu0 %v2010_v39  ;;  %v1845_v31 = vld [vmem:[#allocation2 + $0x244] ss:$24 sps:$4 sm:$0xff]  }
 0x1aa   :  { %425 = vmatprep.subr.bf16.mxu0 %v1773_v33  ;;  %v1843_v33 = vld [vmem:[#allocation2 + $0x240] ss:$24 sps:$4 sm:$0xff]  }
 0x1ad   :  { %426 = vmatpush1.bf16.msra.mxu0 %v1771_v35  ;;  %v1851_v35 = vld [vmem:[#allocation2 + $0x214] ss:$24 sps:$4 sm:$0xff]  }
 0x1ae   :  { %509 = vmatprep.subr.bf16.mxu0 %v1779_v37  ;;  %v1849_v37 = vld [vmem:[#allocation2 + $0x210] ss:$24 sps:$4 sm:$0xff]  }
 0x268   :  { %v294_v41 = vpop.f32.mrf.mxu0 }
 0x269   :  { %v295_v43 = vadd.f32 %v1551_v40, %v294_v41  ;;  %v1860_v41 = vld [vmem:[#allocation2 + $0x24c] ss:$24 sps:$4 sm:$0xff]  }
 0x26a   :  { %v1749_v42 = vpop.f32.mrf.mxu0 }
 0x26b   :  { %v301_v47 = vmax.f32 %v295_v43, 0.0  ;;  %v1855_v42 = vld [vmem:[#allocation2 + $0x1e0] ss:$24 sps:$4 sm:$0xff]  }
 0x26c   :  { %v297_v44 = vpop.f32.mrf.mxu0  ;;  %v1858_v43 = vld [vmem:[#allocation2 + $0x248] ss:$24 sps:$4 sm:$0xff]  }
 0x26d   :  { %v298_v45 = vadd.f32 %v1551_v40, %v297_v44  ;;  %v1857_v40 = vld [vmem:[#allocation2 + $0x1e4] ss:$24 sps:$4 sm:$0xff]   ;;  %v1863_v44 = vld [vmem:[#allocation2 + $0x1b4] ss:$24 sps:$4 sm:$0xff]  }
 0x26e   :  { %v1750_v46 = vpop.f32.mrf.mxu0 }
 0x26f   :  { %v302_v48 = vmax.f32 %v298_v45, 0.0  ;;  %v1866_v45 = vld [vmem:[#allocation2 + $0x21c] ss:$24 sps:$4 sm:$0xff]   ;;  %v1861_v46 = vld [vmem:[#allocation2 + $0x1b0] ss:$24 sps:$4 sm:$0xff]  }
 0x271   :  { %v303_v53 = vpack.c.bf16 %v302_v48, %v301_v47  ;;  %v1864_v47 = vld [vmem:[#allocation2 + $0x218] ss:$24 sps:$4 sm:$0xff]   ;;  %v1869_v48 = vld [vmem:[#allocation2 + $0x184] ss:$24 sps:$4 sm:$0xff]  }
 0x273   :  { %1569 = vmatmul.mubr.msk.bf16.vlgmr.msra.gmra.mxu0 %vm169_vm2, %v303_v53  ;;  %1570 = vmatmul.mubr.msk.bf16.vlgmr.msra.gmra.mxu1 %vm169_vm2, %v303_v53 }
 0x274   :  { %510 = vmatpush1.bf16.msra.mxu0 %v1777_v51  ;;  %1125 = vmatpush1.bf16.msra.mxu1 %v1780_v52  ;;  %v1872_v51 = vld [vmem:[#allocation2 + $0x1ec] ss:$24 sps:$4 sm:$0xff]   ;;  %v1867_v52 = vld [vmem:[#allocation2 + $0x180] ss:$24 sps:$4 sm:$0xff]  }
 0x275   :  { %511 = vmatprep.subr.bf16.mxu0 %v1785_v54  ;;  %1126 = vmatprep.subr.bf16.mxu1 %v1788_v55  ;;  %v2192_v54 = vld [vmem:[%s2325_s1] sm:$0xff]  ;;  %v2197_v55 = vld [vmem:[%s2325_s1 + $0x10] sm:$0xff] }
 0x276   :  { %529 = vmatprep.mubr.bf16.mxu0 %v2010_v39  ;;  %1156 = vmatprep.mubr.bf16.mxu1 %v2178_v56 }
 0x278   :  { %512 = vmatpush1.bf16.msra.mxu0 %v1783_v57  ;;  %1127 = vmatpush1.bf16.msra.mxu1 %v1786_v58  ;;  %v1875_v57 = vld [vmem:[#allocation2 + $0x1bc] ss:$24 sps:$4 sm:$0xff]  }
 0x279   :  { %1128 = vmatprep.subr.bf16.mxu1 %v1791_v59  ;;  %1167 = vmatprep.subr.bf16.mxu0 %v1794_v60  ;;  %v1878_v58 = vld [vmem:[#allocation2 + $0x164] ss:$24 sps:$4 sm:$0xff]   ;;  %v2201_v59 = vpack.c.bf16 %v2197_v55, %v2192_v54  ;;  %v1873_v60 = vld [vmem:[#allocation2 + $0x1b8] ss:$24 sps:$4 sm:$0xff]  }
 0x27b   :  { %1571 = vmatmul.mubr.msk.bf16.vlgmr.msra.gmra.mxu0 %vm169_vm2, %v303_v53  ;;  %v1870_v53 = vld [vmem:[#allocation2 + $0x1e8] ss:$24 sps:$4 sm:$0xff]  }
 0x27c   :  { %1129 = vmatpush1.bf16.msra.mxu1 %v1789_v61  ;;  %1168 = vmatpush1.bf16.msra.mxu0 %v1792_v62  ;;  %v1876_v61 = vld [vmem:[#allocation2 + $0x160] ss:$24 sps:$4 sm:$0xff]   ;;  %v1881_v62 = vld [vmem:[#allocation2 + $0x18c] ss:$24 sps:$4 sm:$0xff]  }
 0x27d   :  { %1130 = vmatprep.subr.bf16.mxu1 %v1797_v63  ;;  %1169 = vmatprep.subr.bf16.mxu0 %v1800_v0  ;;  %v1884_v63 = vld [vmem:[#allocation2 + $0x134] ss:$24 sps:$4 sm:$0xff]   ;;  %v1879_v0 = vld [vmem:[#allocation2 + $0x188] ss:$24 sps:$4 sm:$0xff]  }
 0x27e   :  { %1199 = vmatprep.mubr.bf16.mxu0 %v2178_v56 }
 0x280   :  { %1131 = vmatpush1.bf16.msra.mxu1 %v1795_v1  ;;  %1170 = vmatpush1.bf16.msra.mxu0 %v1798_v2  ;;  %v1882_v1 = vld [vmem:[#allocation2 + $0x130] ss:$24 sps:$4 sm:$0xff]   ;;  %v1887_v2 = vld [vmem:[#allocation2 + $0x104] ss:$24 sps:$4 sm:$0xff]  }
 0x281   :  { %1132 = vmatprep.subr.bf16.mxu1 %v1803_v3  ;;  %1171 = vmatprep.subr.bf16.mxu0 %v1806_v4  ;;  %v1885_v3 = vld [vmem:[#allocation2 + $0x100] ss:$24 sps:$4 sm:$0xff]   ;;  %v1890_v4 = vld [vmem:[#allocation2 + $0xd4] ss:$24 sps:$4 sm:$0xff]  }
 0x284   :  { %1133 = vmatpush1.bf16.msra.mxu1 %v1801_v5  ;;  %1172 = vmatpush1.bf16.msra.mxu0 %v1804_v6  ;;  %v1888_v5 = vld [vmem:[#allocation2 + $0xd0] ss:$24 sps:$4 sm:$0xff]   ;;  %v1893_v6 = vld [vmem:[#allocation2 + $0xa4] ss:$24 sps:$4 sm:$0xff]  }
 0x285   :  { %1134 = vmatprep.subr.bf16.mxu1 %v1809_v7  ;;  %1173 = vmatprep.subr.bf16.mxu0 %v1812_v8  ;;  %v1891_v7 = vld [vmem:[#allocation2 + $0xa0] ss:$24 sps:$4 sm:$0xff]   ;;  %v1896_v8 = vld [vmem:[#allocation2 + $0x74] ss:$24 sps:$4 sm:$0xff]  }
 0x288   :  { %1135 = vmatpush1.bf16.msra.mxu1 %v1807_v9  ;;  %1174 = vmatpush1.bf16.msra.mxu0 %v1810_v10  ;;  %v1894_v9 = vld [vmem:[#allocation2 + $0x70] ss:$24 sps:$4 sm:$0xff]   ;;  %v1899_v10 = vld [vmem:[#allocation2 + $0x44] ss:$24 sps:$4 sm:$0xff]  }
 0x289   :  { %1136 = vmatprep.subr.bf16.mxu1 %v1815_v11  ;;  %1175 = vmatprep.subr.bf16.mxu0 %v1818_v12  ;;  %v1902_v11 = vld [vmem:[#allocation2 + $0x14] ss:$24 sps:$4 sm:$0xff]   ;;  %v1900_v12 = vld [vmem:[#allocation2 + $0x10] ss:$24 sps:$4 sm:$0xff]  }
 0x28c   :  { %1137 = vmatpush1.bf16.msra.mxu1 %v1813_v13  ;;  %1176 = vmatpush1.bf16.msra.mxu0 %v1816_v14  ;;  %v1905_v13 = vld [vmem:[#allocation2 + $0x2e4] ss:$24 sps:$4 sm:$0xff]   ;;  %v1903_v14 = vld [vmem:[#allocation2 + $0x2e0] ss:$24 sps:$4 sm:$0xff]  }
 0x28d   :  { %1138 = vmatprep.subr.bf16.mxu1 %v1821_v15  ;;  %1177 = vmatprep.subr.bf16.mxu0 %v1824_v16  ;;  %v1908_v15 = vld [vmem:[#allocation2 + $0x2b4] ss:$24 sps:$4 sm:$0xff]   ;;  %v1906_v16 = vld [vmem:[#allocation2 + $0x2b0] ss:$24 sps:$4 sm:$0xff]  }
 0x290   :  { %1139 = vmatpush1.bf16.msra.mxu1 %v1819_v17  ;;  %1178 = vmatpush1.bf16.msra.mxu0 %v1822_v18  ;;  %v1911_v17 = vld [vmem:[#allocation2 + $0x284] ss:$24 sps:$4 sm:$0xff]   ;;  %v1909_v18 = vld [vmem:[#allocation2 + $0x280] ss:$24 sps:$4 sm:$0xff]  }
 0x291   :  { %1140 = vmatprep.subr.bf16.mxu1 %v1827_v19  ;;  %1179 = vmatprep.subr.bf16.mxu0 %v1830_v20  ;;  %v1914_v19 = vld [vmem:[#allocation2 + $0x254] ss:$24 sps:$4 sm:$0xff]   ;;  %v1912_v20 = vld [vmem:[#allocation2 + $0x250] ss:$24 sps:$4 sm:$0xff]  }
 0x294   :  { %1141 = vmatpush2.bf16.msra.mxu1 %v1825_v21  ;;  %1180 = vmatpush1.bf16.msra.mxu0 %v1828_v22  ;;  %v1917_v21 = vld [vmem:[#allocation2 + $0x224] ss:$24 sps:$4 sm:$0xff]   ;;  %v1915_v22 = vld [vmem:[#allocation2 + $0x220] ss:$24 sps:$4 sm:$0xff]  }
 0x295   :  { %1142 = vmatprep.subr.bf16.mxu1 %v1833_v23  ;;  %1181 = vmatprep.subr.bf16.mxu0 %v1836_v24  ;;  %v1920_v23 = vld [vmem:[#allocation2 + $0x1f4] ss:$24 sps:$4 sm:$0xff]   ;;  %v1918_v24 = vld [vmem:[#allocation2 + $0x1f0] ss:$24 sps:$4 sm:$0xff]  }
 0x298   :  { %1143 = vmatpush2.bf16.msra.mxu1 %v1831_v25  ;;  %1182 = vmatpush1.bf16.msra.mxu0 %v1834_v26  ;;  %v1923_v25 = vld [vmem:[#allocation2 + $0x1c4] ss:$24 sps:$4 sm:$0xff]   ;;  %v1921_v26 = vld [vmem:[#allocation2 + $0x1c0] ss:$24 sps:$4 sm:$0xff]  }
 0x299   :  { %1144 = vmatprep.subr.bf16.mxu1 %v1839_v27  ;;  %1183 = vmatprep.subr.bf16.mxu0 %v1842_v28  ;;  %v1926_v27 = vld [vmem:[#allocation2 + $0x194] ss:$24 sps:$4 sm:$0xff]   ;;  %v1924_v28 = vld [vmem:[#allocation2 + $0x190] ss:$24 sps:$4 sm:$0xff]  }
 0x29c   :  { %1145 = vmatpush2.bf16.msra.mxu1 %v1837_v29  ;;  %1184 = vmatpush2.bf16.msra.mxu0 %v1840_v30  ;;  %v1927_v29 = vld [vmem:[%s2336_s12 + $0x78] sm:$0xff]  }
 0x29d   :  { %1146 = vmatprep.subr.bf16.mxu1 %v1845_v31  ;;  %1185 = vmatprep.subr.bf16.mxu0 %v1848_v32  ;;  %v1928_v30 = vld [vmem:[%s2336_s12 + $0x38] sm:$0xff]   ;;  %v1929_v31 = vld [vmem:[%s2336_s12 + $0x70] sm:$0xff]  }
 0x29e   :  { %v1930_v32 = vld [vmem:[%s2336_s12 + $0x30] sm:$0xff]  }
 0x2a0   :  { %1147 = vmatpush2.bf16.msra.mxu1 %v1843_v33  ;;  %1186 = vmatpush2.bf16.msra.mxu0 %v1846_v34  ;;  %v1931_v33 = vld [vmem:[%s2336_s12 + $0x68] sm:$0xff]  }
 0x2a1   :  { %1148 = vmatprep.subr.bf16.mxu1 %v1851_v35  ;;  %1187 = vmatprep.subr.bf16.mxu0 %v1854_v36  ;;  %v1932_v34 = vld [vmem:[%s2336_s12 + $0x28] sm:$0xff]   ;;  %v1933_v35 = vld [vmem:[%s2336_s12 + $0x60] sm:$0xff]  }
 0x2a2   :  { %v1934_v36 = vld [vmem:[%s2336_s12 + $0x20] sm:$0xff]  }
 0x2a4   :  { %1149 = vmatpush2.bf16.msra.mxu1 %v1849_v37  ;;  %1188 = vmatpush2.bf16.msra.mxu0 %v1852_v38  ;;  %v1935_v37 = vld [vmem:[%s2336_s12 + $0x58] sm:$0xff]  }
 0x2a5   :  { %1150 = vmatprep.subr.bf16.mxu1 %v1857_v40  ;;  %1189 = vmatprep.subr.bf16.mxu0 %v1860_v41  ;;  %v1936_v38 = vld [vmem:[%s2336_s12 + $0x18] sm:$0xff]   ;;  %v1937_v40 = vld [vmem:[%s2336_s12 + $0x50] sm:$0xff]  }
 0x2a6   :  { %v1938_v41 = vld [vmem:[%s2336_s12 + $0x10] sm:$0xff]  }
 0x2a8   :  { %1151 = vmatpush2.bf16.msra.mxu1 %v1855_v42  ;;  %1190 = vmatpush2.bf16.msra.mxu0 %v1858_v43  ;;  %v1939_v42 = vld [vmem:[%s2336_s12 + $0x48] sm:$0xff]  }
 0x2a9   :  { %1152 = vmatprep.subr.bf16.mxu1 %v1863_v44  ;;  %1191 = vmatprep.subr.bf16.mxu0 %v1866_v45  ;;  %v1940_v43 = vld [vmem:[%s2336_s12 + $0x8] sm:$0xff]   ;;  %v1941_v44 = vld [vmem:[%s2336_s12 + $0x40] sm:$0xff]  }
 0x2aa   :  { %v1942_v45 = vld [vmem:[%s2336_s12] sm:$0xff]  }
 0x2ac   :  { %1153 = vmatpush2.bf16.msra.mxu1 %v1861_v46  ;;  %1192 = vmatpush2.bf16.msra.mxu0 %v1864_v47 }
 0x2ad   :  { %1154 = vmatprep.subr.bf16.mxu1 %v1869_v48  ;;  %1193 = vmatprep.subr.bf16.mxu0 %v1872_v51  ;;  %v318_v51 = vlaneseq }
 0x2b0   :  { %1155 = vmatpush2.bf16.msra.mxu1 %v1867_v52  ;;  %1194 = vmatpush2.bf16.msra.mxu0 %v1870_v53 }
 0x2b1   :  { %1195 = vmatprep.subr.bf16.mxu0 %v1875_v57  ;;  %1210 = vmatprep.subr.bf16.mxu1 %v1878_v58  ;;  %v2255_v57 = vshrl.u32 %v318_v51, 7 }
 0x2b3   :  { %1157 = vmatmul.mubr.bf16.vlgmr.msra.gmra.mxu1 %v2201_v59 }
 0x2b4   :  { %1196 = vmatpush2.bf16.msra.mxu0 %v1873_v60  ;;  %1211 = vmatpush1.bf16.msra.mxu1 %v1876_v61  ;;  %v320_v60 = vsub.s32 0, %v2255_v57  ;;  %v2261_v61 = vld [vmem:[%s2333_s9] sm:$0x3f] }
 0x2b5   :  { %1197 = vmatprep.subr.bf16.mxu0 %v1881_v62  ;;  %1212 = vmatprep.subr.bf16.mxu1 %v1884_v63  ;;  %v324_v63 = vsub.s32 1, %v2255_v57 }
 0x2b6   :  { %1242 = vmatprep.mubr.bf16.mxu1 %v2178_v56  ;;  %v1897_v56 = vld [vmem:[#allocation2 + $0x40] ss:$24 sps:$4 sm:$0xff]  }
 0x2b8   :  { %1198 = vmatpush2.bf16.msra.mxu0 %v1879_v0  ;;  %1213 = vmatpush1.bf16.msra.mxu1 %v1882_v1  ;;  %v321_v1 = vrot.slane %v2261_v61, %v320_v60 }
 0x2b9   :  { %1214 = vmatprep.subr.bf16.mxu1 %v1887_v2  ;;  %1703 = vmatprep.subr.bf16.mxu0 %v1927_v29 }
 0x2bb   :  { %1200 = vmatmul.mubr.bf16.vlgmr.msra.gmra.mxu0 %v2201_v59 }
 0x2bc   :  { %1215 = vmatpush1.bf16.msra.mxu1 %v1885_v3  ;;  %1704 = vmatpush3.bf16.msra.mxu0 %v1928_v30  ;;  %v325_v3 = vrot.slane %v2261_v61, %v324_v63 }
 0x2bd   :  { %1216 = vmatprep.subr.bf16.mxu1 %v1890_v4  ;;  %1705 = vmatprep.subr.bf16.mxu0 %v1929_v31 }
 0x2c0   :  { %1217 = vmatpush1.bf16.msra.mxu1 %v1888_v5  ;;  %1706 = vmatpush3.bf16.msra.mxu0 %v1930_v32 }
 0x2c1   :  { %1218 = vmatprep.subr.bf16.mxu1 %v1893_v6  ;;  %1707 = vmatprep.subr.bf16.mxu0 %v1931_v33 }
 0x2c4   :  { %1219 = vmatpush1.bf16.msra.mxu1 %v1891_v7  ;;  %1708 = vmatpush3.bf16.msra.mxu0 %v1932_v34 }
 0x2c5   :  { %1220 = vmatprep.subr.bf16.mxu1 %v1896_v8  ;;  %1709 = vmatprep.subr.bf16.mxu0 %v1933_v35 }
 0x2c8   :  { %1221 = vmatpush1.bf16.msra.mxu1 %v1894_v9  ;;  %1710 = vmatpush3.bf16.msra.mxu0 %v1934_v36 }
 0x2c9   :  { %1222 = vmatprep.subr.bf16.mxu1 %v1899_v10  ;;  %1711 = vmatprep.subr.bf16.mxu0 %v1935_v37 }
 0x2cc   :  { %1223 = vmatpush1.bf16.msra.mxu1 %v1897_v56  ;;  %1712 = vmatpush3.bf16.msra.mxu0 %v1936_v38 }
 0x2cd   :  { %1224 = vmatprep.subr.bf16.mxu1 %v1902_v11  ;;  %1713 = vmatprep.subr.bf16.mxu0 %v1937_v40 }
 0x2d0   :  { %1225 = vmatpush1.bf16.msra.mxu1 %v1900_v12  ;;  %1714 = vmatpush3.bf16.msra.mxu0 %v1938_v41 }
 0x2d1   :  { %1226 = vmatprep.subr.bf16.mxu1 %v1905_v13  ;;  %1715 = vmatprep.subr.bf16.mxu0 %v1939_v42 }
 0x2d4   :  { %1227 = vmatpush2.bf16.msra.mxu1 %v1903_v14  ;;  %1716 = vmatpush3.bf16.msra.mxu0 %v1940_v43 }
 0x2d5   :  { %1228 = vmatprep.subr.bf16.mxu1 %v1908_v15  ;;  %1717 = vmatprep.subr.bf16.mxu0 %v1941_v44 }
 0x2d8   :  { %1229 = vmatpush2.bf16.msra.mxu1 %v1906_v16  ;;  %1718 = vmatpush3.bf16.msra.mxu0 %v1942_v45 }
 0x2d9   :  { %1230 = vmatprep.subr.bf16.mxu1 %v1911_v17 }
 0x2dc   :  { %1231 = vmatpush2.bf16.msra.mxu1 %v1909_v18 }
 0x2dd   :  { %1232 = vmatprep.subr.bf16.mxu1 %v1914_v19 }
 0x2e0   :  { %1233 = vmatpush2.bf16.msra.mxu1 %v1912_v20  ;;  %v328_v20 = vsub.s32 2, %v2255_v57 }
 0x2e1   :  { %1234 = vmatprep.subr.bf16.mxu1 %v1917_v21 }
 0x2e4   :  { %1235 = vmatpush2.bf16.msra.mxu1 %v1915_v22 }
 0x2e5   :  { %1236 = vmatprep.subr.bf16.mxu1 %v1920_v23  ;;  %v332_v23 = vsub.s32 3, %v2255_v57 }
 0x2e8   :  { %1237 = vmatpush2.bf16.msra.mxu1 %v1918_v24  ;;  %v329_v24 = vrot.slane %v2261_v61, %v328_v20 }
 0x2e9   :  { %1238 = vmatprep.subr.bf16.mxu1 %v1923_v25 }
 0x2ec   :  { %1239 = vmatpush2.bf16.msra.mxu1 %v1921_v26  ;;  %v333_v26 = vrot.slane %v2261_v61, %v332_v23 }
 0x2ed   :  { %1240 = vmatprep.subr.bf16.mxu1 %v1926_v27 }
 0x2f0   :  { %1241 = vmatpush2.bf16.msra.mxu1 %v1924_v28 }
 0x2f3   :  { %1243 = vmatmul.mubr.bf16.vlgmr.msra.gmra.mxu1 %v2201_v59 }
 0x333   :  { %v488_v46 = vpop.f32.mrf.mxu1  ;;  %v445_v47 = vpop.f32.mrf.mxu0 }
 0x334   :  { %v446_v5 = vadd.f32 %v445_v47, %v321_v1  ;;  %v489_v27 = vadd.f32 %v488_v46, %v329_v24 }
 0x335   :  { %v490_v48 = vpop.f32.mrf.mxu1  ;;  %v447_v52 = vpop.f32.mrf.mxu0 }
 0x336   :  { %v448_v7 = vadd.f32 %v447_v52, %v325_v3  ;;  %v491_v29 = vadd.f32 %v490_v48, %v333_v26  ;;  %v546_v52 = vld [vmem:[%s2335_s11] sm:$0x3] }
 0x337   :  { %v492_v53 = vpop.f32.mrf.mxu1  ;;  %v449_v58 = vpop.f32.mrf.mxu0 }
 0x338   :  { %v450_v10 = vadd.f32 %v449_v58, %v321_v1  ;;  %v493_v32 = vadd.f32 %v492_v53, %v329_v24  ;;  %v336_v53 = vsub.s32 4, %v2255_v57  ;;  %v340_v58 = vsub.s32 5, %v2255_v57 }
 0x339   :  { %v494_v59 = vpop.f32.mrf.mxu1  ;;  %v451_v0 = vpop.f32.mrf.mxu0 }
 0x33a   :  { %v452_v12 = vadd.f32 %v451_v0, %v325_v3  ;;  %v495_v36 = vadd.f32 %v494_v59, %v333_v26  ;;  %v1313_v59 = vrot.slane %v546_v52, %v320_v60  ;;  %v1317_v0 = vrot.slane %v546_v52, %v324_v63 }
 0x33b   :  { %v2270_v4 = vpop.f32.mrf.mxu0  ;;  %v341_v3 = vrot.slane %v2261_v61, %v340_v58 }
 0x33d   :  { %v2272_v8 = vpop.f32.mrf.mxu0 }
 0x33f   :  { %v2274_v13 = vpop.f32.mrf.mxu0 }
 0x341   :  { %v2276_v18 = vpop.f32.mrf.mxu0 }
 0x373   :  { %v1158_v62 = vpop.f32.mrf.mxu1 }
 0x374   :  { %v1253_v9 = vadd.f32 %v1158_v62, %v446_v5  ;;  %v337_v62 = vrot.slane %v2261_v61, %v336_v53  ;;  %v1676_v53 = vld [vmem:[%s2337_s13] ss:$0 sm:$0xff] }
 0x375   :  { %v1160_v2 = vpop.f32.mrf.mxu1 }
 0x376   :  { %v1254_v56 = vadd.f32 %v1160_v2, %v448_v7  ;;  %v1668_v14 = vmul.f32 -1.442695, %v1253_v9  ;;  %v536_v61 = vadd.f32 %v2274_v13, %v337_v62 }
 0x377   :  { %v1162_v6 = vpop.f32.mrf.mxu1 }
 0x378   :  { %v1255_v15 = vadd.f32 %v1162_v6, %v450_v10  ;;  %v1669_v16 = vmul.f32 -1.442695, %v1254_v56  ;;  %1943 = vpow2.f32 %v1668_v14  ;;  %v532_v10 = vadd.f32 %v2270_v4, %v337_v62 }
 0x379   :  { %v1164_v11 = vpop.f32.mrf.mxu1 }
 0x37a   :  { %v1256_v17 = vadd.f32 %v1164_v11, %v452_v12  ;;  %v1670_v19 = vmul.f32 -1.442695, %v1255_v15  ;;  %1945 = vpow2.f32 %v1669_v16  ;;  %v534_v16 = vadd.f32 %v2272_v8, %v341_v3 }
 0x37b   :  { %v1201_v22 = vpop.f32.mrf.mxu0 }
 0x37c   :  { %v1671_v21 = vmul.f32 -1.442695, %v1256_v17  ;;  %1947 = vpow2.f32 %v1670_v19  ;;  %v1281_v30 = vadd.f32 %v1201_v22, %v489_v27  ;;  %v538_v27 = vadd.f32 %v2276_v18, %v341_v3 }
 0x37d   :  { %v1203_v25 = vpop.f32.mrf.mxu0 }
 0x37e   :  { %1949 = vpow2.f32 %v1671_v21  ;;  %v1282_v33 = vadd.f32 %v1203_v25, %v491_v29  ;;  %v1672_v37 = vmul.f32 -1.442695, %v1281_v30 }
 0x37f   :  { %v1205_v28 = vpop.f32.mrf.mxu0 }
 0x380   :  { %v1283_v38 = vadd.f32 %v1205_v28, %v493_v32  ;;  %v1673_v42 = vmul.f32 -1.442695, %v1282_v33  ;;  %1951 = vpow2.f32 %v1672_v37 }
 0x381   :  { %v1207_v34 = vpop.f32.mrf.mxu0 }
 0x382   :  { %v1284_v43 = vadd.f32 %v1207_v34, %v495_v36  ;;  %v1674_v47 = vmul.f32 -1.442695, %v1283_v38 }
 0x384   :  { %v1675_v48 = vmul.f32 -1.442695, %v1284_v43 }
 0x385   :  { %v1944_v31 = vpop.eup %1943 }
 0x386   :  { %v1269_v40 = vadd.f32 1.0, %v1944_v31 }
 0x387   :  { %v1946_v35 = vpop.eup %1945 }
 0x388   :  { %v1270_v44 = vadd.f32 1.0, %v1946_v35  ;;  %1953 = vrcp.f32 %v1269_v40 }
 0x389   :  { %v1948_v41 = vpop.eup %1947  ;;  %1955 = vpow2.f32 %v1673_v42 }
 0x38a   :  { %v1271_v46 = vadd.f32 1.0, %v1948_v41  ;;  %1957 = vrcp.f32 %v1270_v44 }
 0x38b   :  { %v1950_v45 = vpop.eup %1949  ;;  %1959 = vpow2.f32 %v1674_v47 }
 0x38c   :  { %v1272_v51 = vadd.f32 1.0, %v1950_v45  ;;  %1961 = vrcp.f32 %v1271_v46 }
 0x38d   :  { %1963 = vpow2.f32 %v1675_v48  ;;  %v1952_v2 = vpop.eup %1951 }
 0x38e   :  { %1965 = vrcp.f32 %v1272_v51  ;;  %v1297_v14 = vadd.f32 1.0, %v1952_v2 }
 0x395   :  { %v1954_v6 = vpop.eup %1953 }
 0x396   :  { %v1956_v9 = vpop.eup %1955 }
 0x397   :  { %v1958_v12 = vpop.eup %1957  ;;  %v1298_v20 = vadd.f32 1.0, %v1956_v9 }
 0x398   :  { %v1960_v15 = vpop.eup %1959 }
 0x399   :  { %v1962_v19 = vpop.eup %1961  ;;  %v1299_v26 = vadd.f32 1.0, %v1960_v15 }
 0x39a   :  { %v1964_v22 = vpop.eup %1963 }
 0x39b   :  { %v1966_v25 = vpop.eup %1965  ;;  %v1300_v29 = vadd.f32 1.0, %v1964_v22 }
 0x3b3   :  { %v1244_v1 = vpop.f32.mrf.mxu1 }
 0x3b4   :  { %v1320_v5 = vadd.f32 %v1313_v59, %v1244_v1 }
 0x3b5   :  { %v1246_v7 = vpop.f32.mrf.mxu1 }
 0x3b6   :  { %v1324_v56 = vmul.f32 %v1954_v6, %v1320_v5  ;;  %v1321_v11 = vadd.f32 %v1317_v0, %v1246_v7 }
 0x3b7   :  { %v1248_v60 = vpop.f32.mrf.mxu1 }
 0x3b8   :  { %v1328_v57 = vadd.f32 %v1324_v56, %v532_v10  ;;  %v1325_v63 = vmul.f32 %v1958_v12, %v1321_v11  ;;  %v1322_v17 = vadd.f32 %v1313_v59, %v1248_v60 }
 0x3b9   :  { %v1250_v21 = vpop.f32.mrf.mxu1 }
 0x3ba   :  { %1967 = vtanh.f32 %v1328_v57  ;;  %v1329_v23 = vadd.f32 %v1325_v63, %v534_v16  ;;  %v1326_v4 = vmul.f32 %v1962_v19, %v1322_v17  ;;  %v1323_v24 = vadd.f32 %v1317_v0, %v1250_v21 }
 0x3bb   :  { %1969 = vrcp.f32 %v1297_v14 }
 0x3bc   :  { %1971 = vtanh.f32 %v1329_v23  ;;  %v1330_v8 = vadd.f32 %v1326_v4, %v536_v61  ;;  %v1327_v28 = vmul.f32 %v1966_v25, %v1323_v24 }
 0x3bd   :  { %1973 = vrcp.f32 %v1298_v20 }
 0x3be   :  { %1975 = vtanh.f32 %v1330_v8  ;;  %v1331_v30 = vadd.f32 %v1327_v28, %v538_v27 }
 0x3bf   :  { %1977 = vrcp.f32 %v1299_v26 }
 0x3c0   :  { %1979 = vtanh.f32 %v1331_v30 }
 0x3c1   :  { %1981 = vrcp.f32 %v1300_v29 }
 0x3c7   :  { %v1968_v13 = vpop.eup %1967 }
 0x3c8   :  { %v1970_v31 = vpop.eup %1969  ;;  %v1336_v32 = vsub.f32 %v2192_v54, %v1968_v13 }
 0x3c9   :  { %v1972_v33 = vpop.eup %1971 }
 0x3ca   :  { %v1974_v34 = vpop.eup %1973  ;;  %v1337_v35 = vsub.f32 %v2163_v49, %v1972_v33  ;;  %v1340_v36 = vmul.f32 %v1970_v31, %v1336_v32 }
 0x3cb   :  { %v1976_v18 = vpop.eup %1975 }
 0x3cc   :  { %v1978_v37 = vpop.eup %1977  ;;  %v1341_v38 = vmul.f32 %v1974_v34, %v1337_v35  ;;  %v1338_v40 = vsub.f32 %v2197_v55, %v1976_v18  ;;  %v1344_v41 = vadd.f32 %v1968_v13, %v1340_v36 }
 0x3cd   :  { %v1980_v42 = vpop.eup %1979 }
 0x3ce   :  { %v1339_v43 = vsub.f32 %v2168_v50, %v1980_v42  ;;  %v1345_v44 = vadd.f32 %v1972_v33, %v1341_v38  ;;  %v1342_v45 = vmul.f32 %v1978_v37, %v1338_v40  ;;  %1530 = vst [vmem:[%s2339_s15] sm:$0xff] %v1344_v41  ;;  %v1982_v54 = vpop.eup %1981 }
 0x3d0   :  { %v1343_v47 = vmul.f32 %v1982_v54, %v1339_v43  ;;  %1531 = vst [vmem:[%s2339_s15 + $0x8] sm:$0xff] %v1345_v44  ;;  %v1346_v49 = vadd.f32 %v1976_v18, %v1342_v45 }
 0x3d2   :  { %v1347_v46 = vadd.f32 %v1980_v42, %v1343_v47  ;;  %1532 = vst [vmem:[%s2339_s15 + $0x10] sm:$0xff] %v1346_v49  ;;  %v1348_v55 = vpack.c.bf16 %v1346_v49, %v1344_v41 }
 0x3d4   :  { %v1349_v50 = vpack.c.bf16 %v1347_v46, %v1345_v44  ;;  %1533 = vst [vmem:[%s2339_s15 + $0x18] sm:$0xff] %v1347_v46  ;;  %v1350_v51 = vmax.bf16 %v2010_v39, %v1348_v55 }
 0x3d6   :  { %v1351_v48 = vmax.bf16 %v2010_v39, %v1349_v50 }
 0x3d8   :  { %1518 = vmatprep.mubr.bf16.mxu0 %v1351_v48 }
 0x3d9   :  { %1519 = vmatmul.mubr.bf16.vlgmr.msra.gmra.mxu0 %v1350_v51 }
 0x499   :  { %v1719_v52 = vpop.f32.mrf.mxu0 }
 0x49b   :  { %v1720_v58 = vpop.f32.mrf.mxu0 }
 0x49c   :  { %v1721_v59 = vadd.f32 %v1720_v58, %v1719_v52 }
 0x49d   :  { %v1722_v62 = vpop.f32.mrf.mxu0 }
 0x49e   :  { %v1521_v0 = vadd.f32 %v1721_v59, %v1676_v53 }
 0x49f   :  { %v1723_v1 = vpop.f32.mrf.mxu0 }
 0x4a0   :  { %1528 = vst.msk [vmem:[%s2338_s14] sm:$0xff] %vm1527_vm4, %v1521_v0  ;;  %v1724_v2 = vadd.f32 %v1723_v1, %v1722_v62 }
 0x4a2   :  { %v1524_v3 = vadd.f32 %v1724_v2, %v1676_v53 }
 0x4a4   :  { %1529 = vst.msk [vmem:[%s2338_s14 + $0x8] sm:$0xff] %vm1527_vm4, %v1524_v3 }
 0x4a5   :  { %1542 = vsyncpa [#allocation3], 1 }

</bundles_post_ra>
